<compile_context>
chip_gen: v5e
topology: v5e:2x2
jax: 0.10.0
libtpu: 0.0.40
codegen_flags: <defaults>
</compile_context>

<pallas_src>
import functools

import jax
import jax.numpy as jnp
from jax.experimental import pallas as pl
from jax.experimental.pallas import tpu as pltpu

LN_EPS = 1e-5        # PyTorch nn.LayerNorm default
MAX_TILE_B = 4096    # batch columns per grid step; sweepable 2048-8192


def _round_up(x, m):
    return ((x + m - 1) // m) * m


def _choose_tile_b(B):
    b = _round_up(max(B, 1), 128)
    if b <= 128:
        return 128
    # Prefer >= 2 grid tiles so dimension_semantics=("parallel",) can shard the
    # batch across both v7x TensorCores (harmless on 1-TC v5e/v6e), capped at
    # MAX_TILE_B and rounded to the 128-lane grain for lane-dense blocks.
    return min(MAX_TILE_B, _round_up((b + 1) // 2, 128))


def _potential_net_kernel(qT_ref, w1T_ref, w2T_ref, vecs_ref, o_ref, *, H0, H1):
    """One batch tile in (feature, batch) layout: Linear -> LN -> Tanh -> Linear -> Linear(->1)."""
    x = qT_ref[...]                                   # (qdim, tile_b)

    # Packed per-feature column vectors (static slices on a tiny resident ref).
    b1 = vecs_ref[:H0, 0:1]                           # Linear1 bias        (H0, 1)
    ln_g = vecs_ref[:H0, 1:2]                         # LayerNorm gamma     (H0, 1)
    ln_b = vecs_ref[:H0, 2:3]                         # LayerNorm beta      (H0, 1)
    b2 = vecs_ref[:H1, 3:4]                           # Linear2 bias        (H1, 1)
    w3 = vecs_ref[:H1, 4:5]                           # out-layer weight    (H1, 1)
    b3 = vecs_ref[0:1, 5:6]                           # out-layer bias      (1, 1)

    # Linear(qdim -> H0) on the MXU: (H0, qdim) @ (qdim, tile_b) -> (H0, tile_b).
    h = jnp.dot(w1T_ref[...], x, preferred_element_type=jnp.float32) + b1

    # LayerNorm over the feature (sublane) axis; rsqrt lands on the EUP slot.
    mu = jnp.mean(h, axis=0, keepdims=True)           # (1, tile_b)
    d = h - mu
    var = jnp.mean(d * d, axis=0, keepdims=True)
    hn = d * jax.lax.rsqrt(var + LN_EPS)
    hn = hn * ln_g + ln_b

    # Tanh activation (LNMLP default), lane-dense.
    a = jnp.tanh(hn)                                  # (H0, tile_b)

    # Linear(H0 -> H1) on the MXU (LNMLP output layer: no LN / activation).
    e = jnp.dot(w2T_ref[...], a.astype(w2T_ref.dtype),
                preferred_element_type=jnp.float32) + b2   # (H1, tile_b)

    # PotentialNet.out: Linear(H1 -> 1) as VPU multiply + sublane reduction,
    # producing a lane-dense (1, tile_b) row (unmasked store).
    o_ref[...] = jnp.sum(e * w3, axis=0, keepdims=True) + b3


def potential_net(q, params, *, tile_b=None, use_bf16=False):
    """q: (B, qdim) f32. params: dict of weights in (in_features, out_features) layout."""
    B, qdim = q.shape
    H0 = params["w1"].shape[1]
    H1 = params["w2"].shape[1]
    Hmax = _round_up(max(H0, H1, 8), 8)

    if tile_b is None:
        tile_b = _choose_tile_b(B)
    else:
        tile_b = max(128, _round_up(tile_b, 128))
    n_tiles = pl.cdiv(B, tile_b)      # last tile may be partial (no jnp.pad copy)

    in_dtype = jnp.bfloat16 if use_bf16 else jnp.float32

    # Transposed activations/weights for the (feature, batch) dataflow.  The
    # q transpose is a single XLA pass over q; weight transposes are tiny.
    qT = q.T.astype(in_dtype)                         # (qdim, B)
    w1T = params["w1"].T.astype(in_dtype)             # (H0, qdim)
    w2T = params["w2"].T.astype(in_dtype)             # (H1, H0)

    def _col(v, h):
        v = jnp.reshape(v, (-1, 1)).astype(jnp.float32)
        return jnp.pad(v, ((0, Hmax - h), (0, 0)))

    # Pack the per-feature vectors + scalar bias into one small (Hmax, 8) array.
    vecs = jnp.concatenate(
        [
            _col(params["b1"], H0),
            _col(params["ln_g"], H0),
            _col(params["ln_b"], H0),
            _col(params["b2"], H1),
            _col(params["w3"], H1),
            jnp.full((Hmax, 1), jnp.reshape(params["b3"], ()), jnp.float32),
            jnp.zeros((Hmax, 2), jnp.float32),        # pad to 8 columns
        ],
        axis=1,
    )                                                 # (Hmax, 8)

    kernel = functools.partial(_potential_net_kernel, H0=H0, H1=H1)

    itemsize = jnp.dtype(in_dtype).itemsize
    cost = pl.CostEstimate(
        flops=int(B * (2 * qdim * H0 + 2 * H0 * H1 + 2 * H1)),
        transcendentals=int(B * (H0 + 1)),            # tanh + rsqrt
        bytes_accessed=int(itemsize * (B * qdim + qdim * H0 + H0 * H1)
                           + 4 * (B + Hmax * 8)),
    )

    out = pl.pallas_call(
        kernel,
        out_shape=jax.ShapeDtypeStruct((1, B), jnp.float32),
        grid_spec=pltpu.PrefetchScalarGridSpec(
            num_scalar_prefetch=0,
            grid=(n_tiles,),
            in_specs=[
                # q^T: tiled along batch (lanes) -> double-buffered, lane-dense DMA.
                pl.BlockSpec((qdim, tile_b), lambda i: (0, i)),
                # Weights: constant index_map -> DMA'd once, stay VMEM-resident.
                pl.BlockSpec((H0, qdim), lambda i: (0, 0)),
                pl.BlockSpec((H1, H0), lambda i: (0, 0)),
                pl.BlockSpec((Hmax, 8), lambda i: (0, 0)),
            ],
            out_specs=pl.BlockSpec((1, tile_b), lambda i: (0, i)),
        ),
        compiler_params=pltpu.CompilerParams(
            dimension_semantics=("parallel",),   # shard batch tiles over v7x's 2 TCs
            # Tiny footprint: (8, tile_b) f32 q tile = tile_b*32 B double-buffered
            # plus a few (Hmax, tile_b) intermediates -> well under 32 MiB even at
            # tile_b=8192, which also respects v7x's 64 MiB/TC physical VMEM.
            vmem_limit_bytes=32 * 1024 * 1024,
        ),
        cost_estimate=cost,
    )(qT, w1T, w2T, vecs)

    return out.reshape(B, 1)


def potential_net_ref(q, params):
    """Pure-JAX reference for correctness checking."""
    h = q @ params["w1"] + params["b1"]
    mu = jnp.mean(h, axis=-1, keepdims=True)
    var = jnp.mean((h - mu) ** 2, axis=-1, keepdims=True)
    h = (h - mu) / jnp.sqrt(var + LN_EPS)
    h = h * params["ln_g"] + params["ln_b"]
    h = jnp.tanh(h)
    e = h @ params["w2"] + params["b2"]
    return e @ params["w3"] + params["b3"]


def init_params(key, qdim, hidden_sizes):
    h0, h1 = hidden_sizes
    ks = jax.random.split(key, 6)
    scale = 0.3
    return {
        # weights stored as (in_features, out_features)
        "w1": scale * jax.random.normal(ks[0], (qdim, h0), jnp.float32),
        "b1": scale * jax.random.normal(ks[1], (1, h0), jnp.float32),
        "ln_g": jnp.ones((1, h0), jnp.float32),    # LayerNorm gamma init = 1
        "ln_b": jnp.zeros((1, h0), jnp.float32),   # LayerNorm beta  init = 0
        "w2": scale * jax.random.normal(ks[2], (h0, h1), jnp.float32),
        "b2": scale * jax.random.normal(ks[3], (1, h1), jnp.float32),
        "w3": scale * jax.random.normal(ks[4], (h1, 1), jnp.float32),
        "b3": scale * jax.random.normal(ks[5], (1, 1), jnp.float32),
    }


if __name__ == "__main__":
    key = jax.random.PRNGKey(0)
    k_q, k_p = jax.random.split(key)

    B, qdim = 8, 8
    hidden_sizes = (32, 32)

    q = jax.random.normal(k_q, (B, qdim), jnp.float32)
    params = init_params(k_p, qdim, hidden_sizes)

    out = jax.block_until_ready(potential_net(q, params))
    ref = potential_net_ref(q, params)
    assert out.shape == (B, 1), out.shape
    assert jnp.allclose(out, ref, atol=1e-4, rtol=1e-4), (out, ref)

    # Ragged batch: >=2 grid tiles plus a partial last tile (no padding copy).
    B2 = 300
    q2 = jax.random.normal(jax.random.PRNGKey(3), (B2, qdim), jnp.float32)
    out2 = jax.block_until_ready(potential_net(q2, params, tile_b=128))
    ref2 = potential_net_ref(q2, params)
    assert out2.shape == (B2, 1), out2.shape
    assert jnp.allclose(out2, ref2, atol=1e-4, rtol=1e-4)

    print("KERNEL_OK")
</pallas_src>

<mosaic_0001>
module attributes {stable_mosaic.version = 11 : i64} {
  func.func @_potential_net_kernel(%arg0: i32, %arg1: memref<8x128xf32, #tpu.memory_space<vmem>>, %arg2: memref<32x8xf32, #tpu.memory_space<vmem>>, %arg3: memref<32x32xf32, #tpu.memory_space<vmem>>, %arg4: memref<32x8xf32, #tpu.memory_space<vmem>>, %arg5: memref<1x128xf32, #tpu.memory_space<vmem>>) attributes {dimension_semantics = [#tpu.dimension_semantics<parallel>], iteration_bounds = array<i64: 1>, scalar_prefetch = 0 : i64, scratch_operands = 0 : i64, tpu.core_type = #tpu.core_type<tc>, window_params = [{transform_indices = @transform_0, window_bounds = array<i64: 8, 128>}, {pipeline_mode = #tpu.pipeline_mode<synchronous>, transform_indices = @transform_1, window_bounds = array<i64: 32, 8>}, {pipeline_mode = #tpu.pipeline_mode<synchronous>, transform_indices = @transform_2, window_bounds = array<i64: 32, 32>}, {pipeline_mode = #tpu.pipeline_mode<synchronous>, transform_indices = @transform_3, window_bounds = array<i64: 32, 8>}, {transform_indices = @transform_4, window_bounds = array<i64: 1, 128>}]} {
    %c0 = arith.constant 0 : index
    %c0_0 = arith.constant 0 : index
    %0 = vector.load %arg1[%c0, %c0_0] : memref<8x128xf32, #tpu.memory_space<vmem>>, vector<8x128xf32>
    %c0_1 = arith.constant 0 : index
    %c0_2 = arith.constant 0 : index
    %1 = vector.load %arg4[%c0_1, %c0_2] : memref<32x8xf32, #tpu.memory_space<vmem>>, vector<32x1xf32>
    %c0_3 = arith.constant 0 : index
    %c1 = arith.constant 1 : index
    %2 = vector.load %arg4[%c0_3, %c1] : memref<32x8xf32, #tpu.memory_space<vmem>>, vector<32x1xf32>
    %c0_4 = arith.constant 0 : index
    %c2 = arith.constant 2 : index
    %3 = vector.load %arg4[%c0_4, %c2] : memref<32x8xf32, #tpu.memory_space<vmem>>, vector<32x1xf32>
    %c0_5 = arith.constant 0 : index
    %c3 = arith.constant 3 : index
    %4 = vector.load %arg4[%c0_5, %c3] : memref<32x8xf32, #tpu.memory_space<vmem>>, vector<32x1xf32>
    %c0_6 = arith.constant 0 : index
    %c4 = arith.constant 4 : index
    %5 = vector.load %arg4[%c0_6, %c4] : memref<32x8xf32, #tpu.memory_space<vmem>>, vector<32x1xf32>
    %c0_7 = arith.constant 0 : index
    %c5 = arith.constant 5 : index
    %6 = vector.load %arg4[%c0_7, %c5] : memref<32x8xf32, #tpu.memory_space<vmem>>, vector<1x1xf32>
    %c0_8 = arith.constant 0 : index
    %c0_9 = arith.constant 0 : index
    %7 = vector.load %arg2[%c0_8, %c0_9] : memref<32x8xf32, #tpu.memory_space<vmem>>, vector<32x8xf32>
    %cst = arith.constant dense<0.000000e+00> : vector<32x128xf32>
    %8 = tpu.matmul %7, %0, %cst {dimension_numbers = #tpu.dot_dimension_numbers<[1], [0], [0], [1], [0, 0, 1, 1], [], []>} : vector<32x8xf32>, vector<8x128xf32>, vector<32x128xf32> -> vector<32x128xf32>
    %9 = vector.broadcast %1 : vector<32x1xf32> to vector<32x128xf32>
    %10 = arith.addf %8, %9 : vector<32x128xf32>
    %cst_10 = arith.constant dense<0.000000e+00> : vector<128xf32>
    %11 = vector.multi_reduction <add>, %10, %cst_10 [0] : vector<32x128xf32> to vector<128xf32>
    %12 = vector.shape_cast %11 : vector<128xf32> to vector<1x128xf32>
    %cst_11 = arith.constant 3.200000e+01 : f32
    %13 = vector.broadcast %cst_11 : f32 to vector<1x128xf32>
    %14 = arith.divf %12, %13 : vector<1x128xf32>
    %15 = vector.broadcast %14 : vector<1x128xf32> to vector<32x128xf32>
    %16 = arith.subf %10, %15 : vector<32x128xf32>
    %17 = arith.mulf %16, %16 : vector<32x128xf32>
    %cst_12 = arith.constant dense<0.000000e+00> : vector<128xf32>
    %18 = vector.multi_reduction <add>, %17, %cst_12 [0] : vector<32x128xf32> to vector<128xf32>
    %19 = vector.shape_cast %18 : vector<128xf32> to vector<1x128xf32>
    %cst_13 = arith.constant 3.200000e+01 : f32
    %20 = vector.broadcast %cst_13 : f32 to vector<1x128xf32>
    %21 = arith.divf %19, %20 : vector<1x128xf32>
    %cst_14 = arith.constant 9.99999974E-6 : f32
    %22 = vector.broadcast %cst_14 : f32 to vector<1x128xf32>
    %23 = arith.addf %21, %22 : vector<1x128xf32>
    %24 = math.rsqrt %23 : vector<1x128xf32>
    %25 = vector.broadcast %24 : vector<1x128xf32> to vector<32x128xf32>
    %26 = arith.mulf %16, %25 : vector<32x128xf32>
    %27 = vector.broadcast %2 : vector<32x1xf32> to vector<32x128xf32>
    %28 = arith.mulf %26, %27 : vector<32x128xf32>
    %29 = vector.broadcast %3 : vector<32x1xf32> to vector<32x128xf32>
    %30 = arith.addf %28, %29 : vector<32x128xf32>
    %31 = math.tanh %30 : vector<32x128xf32>
    %c0_15 = arith.constant 0 : index
    %c0_16 = arith.constant 0 : index
    %32 = vector.load %arg3[%c0_15, %c0_16] : memref<32x32xf32, #tpu.memory_space<vmem>>, vector<32x32xf32>
    %cst_17 = arith.constant dense<0.000000e+00> : vector<32x128xf32>
    %33 = tpu.matmul %32, %31, %cst_17 {dimension_numbers = #tpu.dot_dimension_numbers<[1], [0], [0], [1], [0, 0, 1, 1], [], []>} : vector<32x32xf32>, vector<32x128xf32>, vector<32x128xf32> -> vector<32x128xf32>
    %34 = vector.broadcast %4 : vector<32x1xf32> to vector<32x128xf32>
    %35 = arith.addf %33, %34 : vector<32x128xf32>
    %36 = vector.broadcast %5 : vector<32x1xf32> to vector<32x128xf32>
    %37 = arith.mulf %35, %36 : vector<32x128xf32>
    %cst_18 = arith.constant dense<0.000000e+00> : vector<128xf32>
    %38 = vector.multi_reduction <add>, %37, %cst_18 [0] : vector<32x128xf32> to vector<128xf32>
    %39 = vector.shape_cast %38 : vector<128xf32> to vector<1x128xf32>
    %40 = vector.broadcast %6 : vector<1x1xf32> to vector<1x128xf32>
    %41 = arith.addf %39, %40 : vector<1x128xf32>
    %c0_19 = arith.constant 0 : index
    %c0_20 = arith.constant 0 : index
    %42 = vector.load %arg5[%c0_19, %c0_20] : memref<1x128xf32, #tpu.memory_space<vmem>>, vector<1x128xf32>
    tpu.vector_store %arg5[%c0_19, %c0_20], %41 {strides = array<i32>} : memref<1x128xf32, #tpu.memory_space<vmem>>, vector<1x128xf32>,
    return
  }
  func.func @transform_0(%arg0: i32) -> (i32, i32) {
    %c0_i32 = arith.constant 0 : i32
    %c0_i32_0 = arith.constant 0 : i32
    return %c0_i32, %arg0 : i32, i32
  }
  func.func @transform_1(%arg0: i32) -> (i32, i32) {
    %c0_i32 = arith.constant 0 : i32
    %c0_i32_0 = arith.constant 0 : i32
    %c0_i32_1 = arith.constant 0 : i32
    return %c0_i32, %c0_i32_0 : i32, i32
  }
  func.func @transform_2(%arg0: i32) -> (i32, i32) {
    %c0_i32 = arith.constant 0 : i32
    %c0_i32_0 = arith.constant 0 : i32
    %c0_i32_1 = arith.constant 0 : i32
    return %c0_i32, %c0_i32_0 : i32, i32
  }
  func.func @transform_3(%arg0: i32) -> (i32, i32) {
    %c0_i32 = arith.constant 0 : i32
    %c0_i32_0 = arith.constant 0 : i32
    %c0_i32_1 = arith.constant 0 : i32
    return %c0_i32, %c0_i32_0 : i32, i32
  }
  func.func @transform_4(%arg0: i32) -> (i32, i32) {
    %c0_i32 = arith.constant 0 : i32
    %c0_i32_0 = arith.constant 0 : i32
    return %c0_i32, %arg0 : i32, i32
  }
}

</mosaic_0001>

<bundles_post_ra>
// kernel: tpu_custom_call.1
= control target key start
LH: loop header
LB: loop body
LE: loop exit
PB: predicated region body
PF: predicated region fallthrough
CT: control target
= control target key end

     0   :  { %vm48_vm0 = vcmask 64512   ;;  %v372_v5 = vmov 0   ;;  %s482_s0 = inlined_call_operand.vmem [shape: f32[8,8], index: 0, kind: input, shape index: {}]   ;;  %s483_s1 = inlined_call_operand.vmem [shape: f32[32,8], index: 1, kind: input, shape index: {}]   ;;  %s484_s2 = inlined_call_operand.vmem [shape: f32[32,32], index: 2, kind: input, shape index: {}]   ;;  %s485_s3 = inlined_call_operand.vmem [shape: f32[32,8], index: 3, kind: input, shape index: {}]   ;;  %s486_s4 = inlined_call_operand.hbm [shape: f32[1,8], index: 4, kind: output, shape index: {}]  }
   0x1   :  { %v18_v0 = vld [vmem:[%s482_s0] sm:$0xff]  ;;  %v25_v1 = vld [vmem:[%s483_s1 + $0x8] sm:$0xff]  ;;  %v424_v4 = vld [vmem:[%s485_s3 + $0x10] sm:$0xff]  ;;  %319 = vset.pattern.permute.xlu0 %v372_v5  ;;  %320 = vset.pattern.permute.xlu1 %v372_v5 }
   0x2   :  { %v24_v2 = vld [vmem:[%s483_s1] sm:$0xff]  ;;  %306 = vmatpush.msra.mxu3 %v18_v0  ;;  %76 = vmatpush.msra.mxu0 %v18_v0 }
   0x3   :  { %v417_v3 = vld [vmem:[%s485_s3] sm:$0xff]  ;;  %299 = vmatmul.msk.f32.vlgmr.msra.gmra.mxu3 %vm48_vm0, %v25_v1  ;;  %298 = vmatmul.msk.f32.vlgmr.msra.gmra.mxu0 %vm48_vm0, %v24_v2 }
   0x4   :  { %9 = vsyncpa [#allocation3], 0  ;;  %30 = vperm.xlu0 %319, %v417_v3   ;;  %40 = vperm.xlu1 %320, %v424_v4   ;;  %v431_v6 = vld [vmem:[%s485_s3 + $0x18] sm:$0xff]  ;;  %v373_v7 = vmov 1   ;;  %v26_v8 = vld [vmem:[%s483_s1 + $0x10] sm:$0xff]  ;;  %v374_v11 = vmov 2  }
   0x5   :  { %321 = vset.pattern.permute.xlu2 %v373_v7  ;;  %v440_v9 = vld [vmem:[%s485_s3 + $0x8] sm:$0xff]  ;;  %v27_v10 = vld [vmem:[%s483_s1 + $0x18] sm:$0xff]  ;;  %v375_v14 = vmov 32.0   ;;  %v376_v0 = vmov 3   ;;  %vm204_vm5 = vcmask 261120   ;;  %s289_s17 = sshll.u32 %s486_s4, 4  ;;  %s290_s17 = int_to_ptr.hbm [resolvable:$true] %s289_s17 }
   0x6   :  { %153 = vperm.xlu2 %321, %v431_v6   ;;  %334 = vrcp.f32 %v375_v14 }
   0xb   :  { %300 = vmatmul.msk.f32.gmra.mxu3 %vm48_vm0, %v26_v8 }
   0xc   :  { %35 = vperm.xlu0 %319, %v440_v9   ;;  %45 = vperm.xlu1 %320, %v431_v6   ;;  %v335_v19 = vpop.eup %334 }
   0xd   :  { %v100_v23 = vmul.f32 32.0, %v335_v19  ;;  %vm104_vm1 = vweird.f32 %v335_v19 }
   0xe   :  { %149 = vperm.xlu2 %321, %v424_v4  }
   0xf   :  { %v101_v29 = vsub.f32 1.0, %v100_v23 }
  0x11   :  { %v102_v32 = vmul.f32 %v335_v19, %v101_v29 }
  0x13   :  { %301 = vmatmul.msk.f32.gmra.mxu3 %vm48_vm0, %v27_v10  ;;  %v103_v35 = vadd.f32 %v335_v19, %v102_v32 }
  0x14   :  { %323 = vset.pattern.permute.xlu1 %v373_v7  ;;  %322 = vset.pattern.permute.xlu0 %v374_v11 }
  0x15   :  { %145 = vperm.xlu1 %323, %v440_v9   ;;  %173 = vperm.xlu0 %322, %v431_v6   ;;  %v105_v38 = vsel %vm104_vm1, %v335_v19, %v103_v35 }
  0x16   :  { %324 = vset.pattern.permute.xlu2 %v374_v11 }
  0x17   :  { %169 = vperm.xlu2 %324, %v424_v4  }
  0x1d   :  { %141 = vperm.xlu1 %323, %v417_v3   ;;  %161 = vperm.xlu0 %322, %v417_v3  }
  0x1f   :  { %165 = vperm.xlu2 %324, %v440_v9  }
  0x25   :  { %325 = vset.pattern.permute.xlu1 %v376_v0  ;;  %327 = vset.pattern.permute.xlu0 %v376_v0 }
  0x26   :  { %189 = vperm.xlu1 %325, %v417_v3   ;;  %197 = vperm.xlu0 %327, %v424_v4  }
  0x27   :  { %326 = vset.pattern.permute.xlu2 %v376_v0 }
  0x28   :  { %193 = vperm.xlu2 %326, %v440_v9  }
  0x60   :  { %v154_v58 = vpop.permute.xlu2 %153 }
  0x68   :  { %v150_v61 = vpop.permute.xlu2 %149 }
  0x71   :  { %v170_v8 = vpop.permute.xlu2 %169 }
  0x76   :  { %v31_v12 = vpop.permute.xlu0 %30  ;;  %v41_v15 = vpop.permute.xlu1 %40 }
  0x7e   :  { %v36_v16 = vpop.permute.xlu0 %35  ;;  %v46_v25 = vpop.permute.xlu1 %45 }
  0x80   :  { %v78_v17 = vpop.f32.mrf.mxu0 }
  0x81   :  { %v79_v20 = vadd.f32 %v78_v17, %v31_v12 }
  0x86   :  { %v81_v13 = vpop.f32.mrf.mxu3 }
  0x87   :  { %v82_v21 = vadd.f32 %v81_v13, %v36_v16  ;;  %v146_v5 = vpop.permute.xlu1 %145  ;;  %v174_v11 = vpop.permute.xlu0 %173  ;;  %v377_v13 = vmov 4  }
  0x88   :  { %328 = vset.pattern.permute.xlu1 %v377_v13  ;;  %331 = vset.pattern.permute.xlu0 %v377_v13 }
  0x89   :  { %v90_v24 = vadd.f32 %v82_v21, %v79_v20  ;;  %247 = vperm.xlu1 %328, %v417_v3   ;;  %259 = vperm.xlu0 %331, %v431_v6  }
  0x8a   :  { %329 = vset.pattern.permute.xlu2 %v377_v13 }
  0x8b   :  { %251 = vperm.xlu2 %329, %v440_v9  }
  0x8e   :  { %v84_v18 = vpop.f32.mrf.mxu3 }
  0x8f   :  { %v85_v22 = vadd.f32 %v84_v18, %v41_v15 }
  0x91   :  { %v91_v27 = vadd.f32 %v90_v24, %v85_v22  ;;  %330 = vset.pattern.permute.xlu1 %v376_v0 }
  0x92   :  { %201 = vperm.xlu1 %330, %v431_v6   ;;  %v186_v6 = vld [vmem:[%s484_s2 + $0x10] sm:$0xff] }
  0x93   :  { %255 = vperm.xlu2 %329, %v424_v4   ;;  %v184_v4 = vld [vmem:[%s484_s2] sm:$0xff] }
  0x96   :  { %v87_v26 = vpop.f32.mrf.mxu3 }
  0x97   :  { %v88_v28 = vadd.f32 %v87_v26, %v46_v25  ;;  %v166_v25 = vpop.permute.xlu2 %165 }
  0x99   :  { %v92_v30 = vadd.f32 %v91_v27, %v88_v28  ;;  %v162_v27 = vpop.permute.xlu0 %161 }
  0x9b   :  { %v93_v31 = vrot.slane %v92_v30, 4 }
  0x9d   :  { %v94_v33 = vadd.f32 %v93_v31, %v92_v30  ;;  %v23_v30 = vld [vmem:[%s485_s3] sm:$0x1] }
  0x9f   :  { %v95_v34 = vrot.slane %v94_v33, 2  ;;  %v194_v35 = vpop.permute.xlu2 %193 }
  0xa1   :  { %v96_v36 = vadd.f32 %v95_v34, %v94_v33  ;;  %v185_v33 = vld [vmem:[%s484_s2 + $0x8] sm:$0xff]  ;;  %v187_v34 = vld [vmem:[%s484_s2 + $0x18] sm:$0xff]  ;;  %s379_s2 = smov [#allocation2]  }
  0xa2   :  { %s287_s14 = sshll.u32 %s379_s2, 4  ;;  %s288_s14 = int_to_ptr.vmem [resolvable:$true] %s287_s14 }
  0xa3   :  { %v97_v37 = vrot.slane %v96_v36, 1 }
  0xa5   :  { %v98_v39 = vadd.f32 %v97_v37, %v96_v36 }
  0xa7   :  { %v106_v40 = vmul.f32 %v105_v38, %v98_v39 }
  0xa9   :  { %v107_v41 = vsub.f32 %v79_v20, %v106_v40  ;;  %v108_v42 = vsub.f32 %v82_v21, %v106_v40  ;;  %v109_v43 = vsub.f32 %v85_v22, %v106_v40  ;;  %v110_v44 = vsub.f32 %v88_v28, %v106_v40  ;;  %v142_v22 = vpop.permute.xlu1 %141  ;;  %v198_v40 = vpop.permute.xlu0 %197 }
  0xaa   :  { %v378_v28 = vmov 5  }
  0xab   :  { %v111_v45 = vmul.f32 %v107_v41, %v107_v41  ;;  %v112_v46 = vmul.f32 %v108_v42, %v108_v42  ;;  %v113_v47 = vmul.f32 %v109_v43, %v109_v43  ;;  %v114_v49 = vmul.f32 %v110_v44, %v110_v44  ;;  %333 = vset.pattern.permute.xlu0 %v378_v28 }
  0xac   :  { %332 = vset.pattern.permute.xlu1 %v378_v28 }
  0xad   :  { %v115_v48 = vadd.f32 %v112_v46, %v111_v45  ;;  %277 = vperm.xlu1 %332, %v23_v30  }
  0xaf   :  { %v116_v50 = vadd.f32 %v115_v48, %v113_v47 }
  0xb1   :  { %v117_v51 = vadd.f32 %v116_v50, %v114_v49  ;;  %v190_v36 = vpop.permute.xlu1 %189 }
  0xb3   :  { %v118_v52 = vrot.slane %v117_v51, 4 }
  0xb5   :  { %v119_v53 = vadd.f32 %v118_v52, %v117_v51 }
  0xb7   :  { %v120_v54 = vrot.slane %v119_v53, 2 }
  0xb9   :  { %v121_v55 = vadd.f32 %v120_v54, %v119_v53 }
  0xbb   :  { %v122_v56 = vrot.slane %v121_v55, 1 }
  0xbd   :  { %v123_v57 = vadd.f32 %v122_v56, %v121_v55 }
  0xbf   :  { %v124_v59 = vmul.f32 %v123_v57, %v105_v38 }
  0xc1   :  { %v125_v60 = vadd.f32 1e-05, %v124_v59 }
  0xc3   :  { %336 = vrsqrt.f32 %v125_v60  ;;  %vm132_vm3 = vweird.f32 %v125_v60 }
  0xc9   :  { %v337_v62 = vpop.eup %336 }
  0xca   :  { %v127_v63 = vmul.f32 %v337_v62, %v125_v60  ;;  %vm133_vm2 = vweird.f32 %v337_v62 }
  0xcb   :  { %vm134_vm4 = vmor %vm132_vm3, %vm133_vm2 }
  0xcc   :  { %v128_v1 = vmul.f32 %v337_v62, %v127_v63 }
  0xce   :  { %v129_v2 = vmul.f32 0.5, %v128_v1 }
  0xd0   :  { %v130_v7 = vsub.f32 1.5, %v129_v2 }
  0xd2   :  { %v131_v10 = vmul.f32 %v337_v62, %v130_v7 }
  0xd4   :  { %v135_v12 = vsel %vm134_vm4, %v337_v62, %v131_v10 }
  0xd5   :  { %v139_v14 = vmul.f32 %v135_v12, %v110_v44  ;;  %v138_v15 = vmul.f32 %v135_v12, %v109_v43  ;;  %v137_v16 = vmul.f32 %v135_v12, %v108_v42  ;;  %v136_v17 = vmul.f32 %v135_v12, %v107_v41 }
  0xd7   :  { %v159_v18 = vmul.f32 %v154_v58, %v139_v14  ;;  %v158_v19 = vmul.f32 %v150_v61, %v138_v15  ;;  %v157_v20 = vmul.f32 %v146_v5, %v137_v16  ;;  %v156_v24 = vmul.f32 %v142_v22, %v136_v17 }
  0xd9   :  { %v179_v21 = vadd.f32 %v174_v11, %v159_v18  ;;  %v178_v23 = vadd.f32 %v170_v8, %v158_v19  ;;  %v177_v26 = vadd.f32 %v166_v25, %v157_v20  ;;  %v176_v3 = vadd.f32 %v162_v27, %v156_v24 }
  0xdb   :  { %338 = vtanh.f32 %v179_v21 }
  0xdc   :  { %340 = vtanh.f32 %v178_v23 }
  0xdd   :  { %342 = vtanh.f32 %v177_v26 }
  0xde   :  { %344 = vtanh.f32 %v176_v3 }
  0xe1   :  { %v339_v9 = vpop.eup %338 }
  0xe2   :  { %229 = vmatpush.msra.mxu1 %v339_v9  ;;  %307 = vmatpush.msra.mxu2 %v339_v9  ;;  %v341_v29 = vpop.eup %340 }
  0xe3   :  { %v343_v31 = vpop.eup %342 }
  0xe4   :  { %230 = vmatpush.msra.mxu1 %v341_v29  ;;  %308 = vmatpush.msra.mxu2 %v341_v29  ;;  %v345_v32 = vpop.eup %344 }
  0xe5   :  { %v252_v38 = vpop.permute.xlu2 %251 }
  0xe6   :  { %231 = vmatpush.msra.mxu1 %v343_v31  ;;  %309 = vmatpush.msra.mxu2 %v343_v31 }
  0xe8   :  { %232 = vmatpush.msra.mxu1 %v345_v32  ;;  %310 = vmatpush.msra.mxu2 %v345_v32 }
  0xe9   :  { %302 = vmatmul.msk.f32.vlgmr.msra.gmra.mxu1 %vm204_vm5, %v184_v4  ;;  %304 = vmatmul.msk.f32.vlgmr.msra.gmra.mxu2 %vm204_vm5, %v186_v6 }
  0xed   :  { %v256_v49 = vpop.permute.xlu2 %255 }
  0xf1   :  { %303 = vmatmul.msk.f32.gmra.mxu1 %vm204_vm5, %v185_v33  ;;  %305 = vmatmul.msk.f32.gmra.mxu2 %vm204_vm5, %v187_v34 }
  0xfb   :  { %v248_v39 = vpop.permute.xlu1 %247  ;;  %v260_v52 = vpop.permute.xlu0 %259 }
 0x104   :  { %v202_v48 = vpop.permute.xlu1 %201 }
 0x11f   :  { %v278_v63 = vpop.permute.xlu1 %277 }
 0x166   :  { %v234_v37 = vpop.f32.mrf.mxu1 }
 0x167   :  { %v235_v42 = vadd.f32 %v234_v37, %v190_v36 }
 0x169   :  { %v262_v45 = vmul.f32 %v248_v39, %v235_v42 }
 0x16c   :  { %v240_v41 = vpop.f32.mrf.mxu2 }
 0x16d   :  { %v241_v46 = vadd.f32 %v240_v41, %v198_v40 }
 0x16e   :  { %v237_v43 = vpop.f32.mrf.mxu1 }
 0x16f   :  { %v238_v44 = vadd.f32 %v237_v43, %v194_v35  ;;  %v264_v53 = vmul.f32 %v256_v49, %v241_v46 }
 0x171   :  { %v263_v47 = vmul.f32 %v252_v38, %v238_v44 }
 0x173   :  { %v266_v50 = vadd.f32 %v263_v47, %v262_v45 }
 0x174   :  { %v243_v51 = vpop.f32.mrf.mxu2 }
 0x175   :  { %v244_v54 = vadd.f32 %v243_v51, %v202_v48  ;;  %v267_v56 = vadd.f32 %v266_v50, %v264_v53 }
 0x177   :  { %v265_v55 = vmul.f32 %v260_v52, %v244_v54 }
 0x179   :  { %v268_v57 = vadd.f32 %v267_v56, %v265_v55 }
 0x17b   :  { %v269_v58 = vrot.slane %v268_v57, 4 }
 0x17d   :  { %v270_v59 = vadd.f32 %v269_v58, %v268_v57 }
 0x17f   :  { %v271_v60 = vrot.slane %v270_v59, 2 }
 0x181   :  { %v272_v61 = vadd.f32 %v271_v60, %v270_v59 }
 0x183   :  { %v273_v62 = vrot.slane %v272_v61, 1 }
 0x185   :  { %v274_v0 = vadd.f32 %v273_v62, %v272_v61 }
 0x187   :  { %v280_v1 = vadd.f32 %v278_v63, %v274_v0 }
 0x189   :  { %281 = vst [vmem:[#allocation2] sm:$0x1] %v280_v1 }
 0x18a   :  { %292 = dma.vmem_to_hbm [thread:$0]  %s288_s14, 16, %s290_s17, [#allocation3]  }
 0x18b   :  { %370 = dma.done.wait [#allocation3], 16  }
 0x18c   :  { %371 = vsyncadd [#allocation3], 4294967280 }
 0x18d   :  { %297 = vsyncpa [#allocation3], 1 }

</bundles_post_ra>
